<compile_context>
chip_gen: v6e
topology: v6e:2x2x1
jax: 0.10.0
libtpu: 0.0.40
codegen_flags: <defaults>
</compile_context>

<pallas_src>
import jax
import jax.numpy as jnp
from jax.experimental import pallas as pl
from jax.experimental.pallas import tpu as pltpu


def _round_up(n, m):
    return ((n + m - 1) // m) * m


def critic_kernel(x_ref, w_ref, b_ref, out_ref):
    def _silu(v):
        # v * sigmoid(v); the reciprocal routes to the EUP (approx vrcp).
        return v * pl.reciprocal(1.0 + jnp.exp(-v), approx=True)

    h = x_ref[...]                                             # (TB, P) f32
    for layer in range(3):
        h = jnp.dot(h.astype(jnp.bfloat16), w_ref[layer],
                    preferred_element_type=jnp.float32) + b_ref[layer]
        h = _silu(h)
    # final linear head (no activation); lane-dense (TB, P) store, col 0 valid.
    out_ref[...] = jnp.dot(h.astype(jnp.bfloat16), w_ref[3],
                           preferred_element_type=jnp.float32) + b_ref[3]


def critic_forward(x, w_slab, b_slab):
    """x: [B, n_obs + n_act] f32; w_slab: (4, P, P) bf16; b_slab: (4, 1, P) f32.

    Returns q: [B, 1] f32.
    """
    B, d_in = x.shape
    P = w_slab.shape[-1]

    # Batch tile: multiple of 8, capped so double-buffered tiles stay small
    # even against v7x's 64 MiB VMEM.
    TB = min(512, _round_up(max(B, 1), 8))
    B_pad = _round_up(B, TB)

    x_pad = jnp.zeros((B_pad, P), jnp.float32).at[:B, :d_in].set(x)

    flops = 2 * B_pad * P * P * 4                      # 4 padded matmuls
    transcendentals = 2 * 3 * B_pad * P                # exp + recip per SiLU
    bytes_accessed = (x_pad.size * 4 + w_slab.size * 2 +
                      b_slab.size * 4 + B_pad * P * 4)

    out = pl.pallas_call(
        critic_kernel,
        out_shape=jax.ShapeDtypeStruct((B_pad, P), jnp.float32),
        grid=(B_pad // TB,),
        in_specs=[
            pl.BlockSpec((TB, P), lambda i: (i, 0)),            # activations tile
            pl.BlockSpec(w_slab.shape, lambda i: (0, 0, 0)),    # weights resident
            pl.BlockSpec(b_slab.shape, lambda i: (0, 0, 0)),    # biases resident
        ],
        out_specs=pl.BlockSpec((TB, P), lambda i: (i, 0)),
        compiler_params=pltpu.CompilerParams(
            dimension_semantics=("parallel",)),
        cost_estimate=pl.CostEstimate(
            flops=flops,
            transcendentals=transcendentals,
            bytes_accessed=bytes_accessed),
    )(x_pad, w_slab, b_slab)

    return out[:B, :1]


def _orthogonal(key, out_dim, in_dim):
    """Orthogonal init matching torch.nn.init.orthogonal_ semantics."""
    n, m = max(out_dim, in_dim), min(out_dim, in_dim)
    a = jax.random.normal(key, (n, m), dtype=jnp.float32)
    q, r = jnp.linalg.qr(a)
    q = q * jnp.sign(jnp.diag(r))[None, :]
    if out_dim < in_dim:
        q = q.T
    return q  # (out_dim, in_dim)


def init_critic_params(key, n_obs, n_act, n_hidden):
    d_in = n_obs + n_act
    dims = [
        ("w1", "b1", d_in, n_hidden * 2),
        ("w2", "b2", n_hidden * 2, n_hidden),
        ("w3", "b3", n_hidden, n_hidden),
        ("w4", "b4", n_hidden, 1),
    ]
    ks = jax.random.split(key, 2 * len(dims))
    params = {}
    for i, (wn, bn, din, dout) in enumerate(dims):
        w_torch = _orthogonal(ks[2 * i], dout, din)             # (out, in) like PyTorch
        params[wn] = jnp.asarray(w_torch.T, dtype=jnp.float32)  # stored (in, out)
        bound = 1.0 / (din ** 0.5)                              # PyTorch bias default
        params[bn] = jax.random.uniform(
            ks[2 * i + 1], (1, dout), minval=-bound, maxval=bound, dtype=jnp.float32)
    return params


def pack_critic_params(params, d_in, n_hidden):
    """Pack + zero-pad the 8 tensors into one bf16 weight slab and one f32 bias slab."""
    dims = [(d_in, 2 * n_hidden), (2 * n_hidden, n_hidden),
            (n_hidden, n_hidden), (n_hidden, 1)]
    P = _round_up(max(max(a, b) for a, b in dims), 128)
    w_slab = jnp.zeros((4, P, P), jnp.float32)
    b_slab = jnp.zeros((4, 1, P), jnp.float32)
    names = [("w1", "b1"), ("w2", "b2"), ("w3", "b3"), ("w4", "b4")]
    for i, ((wn, bn), (din, dout)) in enumerate(zip(names, dims)):
        w_slab = w_slab.at[i, :din, :dout].set(params[wn])
        b_slab = b_slab.at[i, :1, :dout].set(params[bn])
    return w_slab.astype(jnp.bfloat16), b_slab


def critic_reference(x, params):
    """Pure-JAX reference with the same bf16-operand / f32-accumulate matmul math."""
    def lin(h, w, b):
        return jnp.dot(h.astype(jnp.bfloat16), w.astype(jnp.bfloat16),
                       preferred_element_type=jnp.float32) + b
    h = jax.nn.silu(lin(x, params["w1"], params["b1"]))
    h = jax.nn.silu(lin(h, params["w2"], params["b2"]))
    h = jax.nn.silu(lin(h, params["w3"], params["b3"]))
    return lin(h, params["w4"], params["b4"])


if __name__ == "__main__":
    n_obs, n_act, n_hidden, batch = 8, 4, 32, 8
    d_in = n_obs + n_act

    key = jax.random.PRNGKey(0)
    k_params, k_x = jax.random.split(key)
    params = init_critic_params(k_params, n_obs, n_act, n_hidden)
    w_slab, b_slab = pack_critic_params(params, d_in, n_hidden)

    x = jax.random.normal(k_x, (batch, d_in), dtype=jnp.float32)

    q = critic_forward(x, w_slab, b_slab)
    jax.block_until_ready(q)

    q_ref = critic_reference(x, params)
    assert q.shape == (batch, 1)
    err = jnp.max(jnp.abs(q - q_ref))
    assert jnp.allclose(q, q_ref, atol=1e-2, rtol=1e-2), f"max abs err {err}"

    print("KERNEL_OK")
</pallas_src>

<mosaic_0001>
module attributes {stable_mosaic.version = 11 : i64} {
  func.func @critic_kernel(%arg0: i32, %arg1: memref<8x128xf32, #tpu.memory_space<vmem>>, %arg2: memref<4x128x128xbf16, #tpu.memory_space<vmem>>, %arg3: memref<4x1x128xf32, #tpu.memory_space<vmem>>, %arg4: memref<8x128xf32, #tpu.memory_space<vmem>>) attributes {dimension_semantics = [#tpu.dimension_semantics<parallel>], iteration_bounds = array<i64: 1>, scalar_prefetch = 0 : i64, scratch_operands = 0 : i64, tpu.core_type = #tpu.core_type<tc>, window_params = [{transform_indices = @transform_0, window_bounds = array<i64: 8, 128>}, {pipeline_mode = #tpu.pipeline_mode<synchronous>, transform_indices = @transform_1, window_bounds = array<i64: 4, 128, 128>}, {pipeline_mode = #tpu.pipeline_mode<synchronous>, transform_indices = @transform_2, window_bounds = array<i64: 4, 1, 128>}, {transform_indices = @transform_3, window_bounds = array<i64: 8, 128>}]} {
    %c0 = arith.constant 0 : index
    %c0_0 = arith.constant 0 : index
    %0 = vector.load %arg1[%c0, %c0_0] : memref<8x128xf32, #tpu.memory_space<vmem>>, vector<8x128xf32>
    %1 = arith.truncf %0 : vector<8x128xf32> to vector<8x128xbf16>
    %c0_1 = arith.constant 0 : index
    %c0_2 = arith.constant 0 : index
    %c0_3 = arith.constant 0 : index
    %2 = vector.load %arg2[%c0_1, %c0_2, %c0_3] : memref<4x128x128xbf16, #tpu.memory_space<vmem>>, vector<1x128x128xbf16>
    %3 = vector.shape_cast %2 : vector<1x128x128xbf16> to vector<128x128xbf16>
    %cst = arith.constant dense<0.000000e+00> : vector<8x128xf32>
    %4 = tpu.matmul %1, %3, %cst {dimension_numbers = #tpu.dot_dimension_numbers<[1], [0], [0], [1], [0, 0, 1, 1], [], []>} : vector<8x128xbf16>, vector<128x128xbf16>, vector<8x128xf32> -> vector<8x128xf32>
    %c0_4 = arith.constant 0 : index
    %c0_5 = arith.constant 0 : index
    %c0_6 = arith.constant 0 : index
    %5 = vector.load %arg3[%c0_4, %c0_5, %c0_6] : memref<4x1x128xf32, #tpu.memory_space<vmem>>, vector<1x1x128xf32>
    %6 = vector.shape_cast %5 : vector<1x1x128xf32> to vector<1x128xf32>
    %7 = vector.broadcast %6 : vector<1x128xf32> to vector<8x128xf32>
    %8 = arith.addf %4, %7 : vector<8x128xf32>
    %cst_7 = arith.constant 0.000000e+00 : f32
    %9 = vector.broadcast %cst_7 : f32 to vector<8x128xf32>
    %10 = arith.subf %9, %8 : vector<8x128xf32>
    %11 = math.exp %10 : vector<8x128xf32>
    %cst_8 = arith.constant 1.000000e+00 : f32
    %12 = vector.broadcast %cst_8 : f32 to vector<8x128xf32>
    %13 = arith.addf %12, %11 : vector<8x128xf32>
    %14 = tpu.reciprocal %13 {approx = true} : vector<8x128xf32> -> vector<8x128xf32>
    %15 = arith.mulf %8, %14 : vector<8x128xf32>
    %16 = arith.truncf %15 : vector<8x128xf32> to vector<8x128xbf16>
    %c1 = arith.constant 1 : index
    %c0_9 = arith.constant 0 : index
    %c0_10 = arith.constant 0 : index
    %17 = vector.load %arg2[%c1, %c0_9, %c0_10] : memref<4x128x128xbf16, #tpu.memory_space<vmem>>, vector<1x128x128xbf16>
    %18 = vector.shape_cast %17 : vector<1x128x128xbf16> to vector<128x128xbf16>
    %cst_11 = arith.constant dense<0.000000e+00> : vector<8x128xf32>
    %19 = tpu.matmul %16, %18, %cst_11 {dimension_numbers = #tpu.dot_dimension_numbers<[1], [0], [0], [1], [0, 0, 1, 1], [], []>} : vector<8x128xbf16>, vector<128x128xbf16>, vector<8x128xf32> -> vector<8x128xf32>
    %c1_12 = arith.constant 1 : index
    %c0_13 = arith.constant 0 : index
    %c0_14 = arith.constant 0 : index
    %20 = vector.load %arg3[%c1_12, %c0_13, %c0_14] : memref<4x1x128xf32, #tpu.memory_space<vmem>>, vector<1x1x128xf32>
    %21 = vector.shape_cast %20 : vector<1x1x128xf32> to vector<1x128xf32>
    %22 = vector.broadcast %21 : vector<1x128xf32> to vector<8x128xf32>
    %23 = arith.addf %19, %22 : vector<8x128xf32>
    %cst_15 = arith.constant 0.000000e+00 : f32
    %24 = vector.broadcast %cst_15 : f32 to vector<8x128xf32>
    %25 = arith.subf %24, %23 : vector<8x128xf32>
    %26 = math.exp %25 : vector<8x128xf32>
    %cst_16 = arith.constant 1.000000e+00 : f32
    %27 = vector.broadcast %cst_16 : f32 to vector<8x128xf32>
    %28 = arith.addf %27, %26 : vector<8x128xf32>
    %29 = tpu.reciprocal %28 {approx = true} : vector<8x128xf32> -> vector<8x128xf32>
    %30 = arith.mulf %23, %29 : vector<8x128xf32>
    %31 = arith.truncf %30 : vector<8x128xf32> to vector<8x128xbf16>
    %c2 = arith.constant 2 : index
    %c0_17 = arith.constant 0 : index
    %c0_18 = arith.constant 0 : index
    %32 = vector.load %arg2[%c2, %c0_17, %c0_18] : memref<4x128x128xbf16, #tpu.memory_space<vmem>>, vector<1x128x128xbf16>
    %33 = vector.shape_cast %32 : vector<1x128x128xbf16> to vector<128x128xbf16>
    %cst_19 = arith.constant dense<0.000000e+00> : vector<8x128xf32>
    %34 = tpu.matmul %31, %33, %cst_19 {dimension_numbers = #tpu.dot_dimension_numbers<[1], [0], [0], [1], [0, 0, 1, 1], [], []>} : vector<8x128xbf16>, vector<128x128xbf16>, vector<8x128xf32> -> vector<8x128xf32>
    %c2_20 = arith.constant 2 : index
    %c0_21 = arith.constant 0 : index
    %c0_22 = arith.constant 0 : index
    %35 = vector.load %arg3[%c2_20, %c0_21, %c0_22] : memref<4x1x128xf32, #tpu.memory_space<vmem>>, vector<1x1x128xf32>
    %36 = vector.shape_cast %35 : vector<1x1x128xf32> to vector<1x128xf32>
    %37 = vector.broadcast %36 : vector<1x128xf32> to vector<8x128xf32>
    %38 = arith.addf %34, %37 : vector<8x128xf32>
    %cst_23 = arith.constant 0.000000e+00 : f32
    %39 = vector.broadcast %cst_23 : f32 to vector<8x128xf32>
    %40 = arith.subf %39, %38 : vector<8x128xf32>
    %41 = math.exp %40 : vector<8x128xf32>
    %cst_24 = arith.constant 1.000000e+00 : f32
    %42 = vector.broadcast %cst_24 : f32 to vector<8x128xf32>
    %43 = arith.addf %42, %41 : vector<8x128xf32>
    %44 = tpu.reciprocal %43 {approx = true} : vector<8x128xf32> -> vector<8x128xf32>
    %45 = arith.mulf %38, %44 : vector<8x128xf32>
    %46 = arith.truncf %45 : vector<8x128xf32> to vector<8x128xbf16>
    %c3 = arith.constant 3 : index
    %c0_25 = arith.constant 0 : index
    %c0_26 = arith.constant 0 : index
    %47 = vector.load %arg2[%c3, %c0_25, %c0_26] : memref<4x128x128xbf16, #tpu.memory_space<vmem>>, vector<1x128x128xbf16>
    %48 = vector.shape_cast %47 : vector<1x128x128xbf16> to vector<128x128xbf16>
    %cst_27 = arith.constant dense<0.000000e+00> : vector<8x128xf32>
    %49 = tpu.matmul %46, %48, %cst_27 {dimension_numbers = #tpu.dot_dimension_numbers<[1], [0], [0], [1], [0, 0, 1, 1], [], []>} : vector<8x128xbf16>, vector<128x128xbf16>, vector<8x128xf32> -> vector<8x128xf32>
    %c3_28 = arith.constant 3 : index
    %c0_29 = arith.constant 0 : index
    %c0_30 = arith.constant 0 : index
    %50 = vector.load %arg3[%c3_28, %c0_29, %c0_30] : memref<4x1x128xf32, #tpu.memory_space<vmem>>, vector<1x1x128xf32>
    %51 = vector.shape_cast %50 : vector<1x1x128xf32> to vector<1x128xf32>
    %52 = vector.broadcast %51 : vector<1x128xf32> to vector<8x128xf32>
    %53 = arith.addf %49, %52 : vector<8x128xf32>
    %c0_31 = arith.constant 0 : index
    %c0_32 = arith.constant 0 : index
    %54 = vector.load %arg4[%c0_31, %c0_32] : memref<8x128xf32, #tpu.memory_space<vmem>>, vector<8x128xf32>
    tpu.vector_store %arg4[%c0_31, %c0_32], %53 {strides = array<i32>} : memref<8x128xf32, #tpu.memory_space<vmem>>, vector<8x128xf32>,
    return
  }
  func.func @transform_0(%arg0: i32) -> (i32, i32) {
    %c0_i32 = arith.constant 0 : i32
    %c0_i32_0 = arith.constant 0 : i32
    return %arg0, %c0_i32 : i32, i32
  }
  func.func @transform_1(%arg0: i32) -> (i32, i32, i32) {
    %c0_i32 = arith.constant 0 : i32
    %c0_i32_0 = arith.constant 0 : i32
    %c0_i32_1 = arith.constant 0 : i32
    %c0_i32_2 = arith.constant 0 : i32
    return %c0_i32, %c0_i32_0, %c0_i32_1 : i32, i32, i32
  }
  func.func @transform_2(%arg0: i32) -> (i32, i32, i32) {
    %c0_i32 = arith.constant 0 : i32
    %c0_i32_0 = arith.constant 0 : i32
    %c0_i32_1 = arith.constant 0 : i32
    %c0_i32_2 = arith.constant 0 : i32
    return %c0_i32, %c0_i32_0, %c0_i32_1 : i32, i32, i32
  }
  func.func @transform_3(%arg0: i32) -> (i32, i32) {
    %c0_i32 = arith.constant 0 : i32
    %c0_i32_0 = arith.constant 0 : i32
    return %arg0, %c0_i32 : i32, i32
  }
}

</mosaic_0001>

<bundles_post_ra>
// kernel: tpu_custom_call.1
= control target key start
LH: loop header
LB: loop body
LE: loop exit
PB: predicated region body
PF: predicated region fallthrough
CT: control target
= control target key end

     0   :  { %8 = vsyncpa [#allocation3], 0  ;;  %s919_s0 = inlined_call_operand.hbm [shape: f32[8,128], index: 0, kind: input, shape index: {}]   ;;  %s920_s1 = inlined_call_operand.hbm [shape: bf16[4,128,128], index: 1, kind: input, shape index: {}]   ;;  %s921_s2 = inlined_call_operand.hbm [shape: f32[4,1,128], index: 2, kind: input, shape index: {}]   ;;  %s922_s3 = inlined_call_operand.hbm [shape: f32[8,128], index: 3, kind: output, shape index: {}]  }
   0x1   :  { %9 = vsyncpa [#allocation6], 0 }
   0x2   :  { %10 = vsyncpa [#allocation4], 0  ;;  %s837_s12 = smov [#allocation5]  }
   0x3   :  { %s26_s13 = sshll.u32 %s837_s12, 4  ;;  %s27_s13 = int_to_ptr.vmem [resolvable:$true] %s26_s13 }
   0x4   :  { %s759_s14 = scalar_lea.vmem %s27_s13, 4096  ;;  %p764_p1 = scmp.lt.s32.totalorder %s27_s13, %s27_s13 }
   0x5   :  { %p760_p0 = scmp.ne.s32.totalorder %s27_s13, %s759_s14  ;;  %p765_p2 = scmp.lt.s32.totalorder %s759_s14, %s759_s14 }
   0x7   :  { %p766_p3 = por %p765_p2, %p764_p1 }
   0x9   :  { %p767_p4 = pnand %p766_p3, %p760_p0 }
   0xb   :  { %770 = shalt.err (!%p767_p4)
}
   0xc   :  { %s838_s15 = smov 64   ;;  %s839_s16 = smov 4  }
   0xd   :  { %32 = dma.hbm_to_vmem [thread:$0]  %s920_s1, 4096, %s27_s13, [#allocation6], %s838_s15, %s838_s15, %s839_s16  }
   0xe   :  { %s840_s19 = smov [#allocation2]   ;;  %s841_s21 = smov [#allocation7]  }
   0xf   :  { %s17_s20 = sshll.u32 %s840_s19, 4  ;;  %s38_s22 = sshll.u32 %s841_s21, 4  ;;  %s18_s20 = int_to_ptr.vmem [resolvable:$true] %s17_s20  ;;  %s39_s22 = int_to_ptr.vmem [resolvable:$true] %s38_s22 }
  0x10   :  { %s779_s23 = scalar_lea.vmem %s18_s20, 128  ;;  %p784_p6 = scmp.lt.s32.totalorder %s18_s20, %s18_s20 }
  0x11   :  { %p780_p5 = scmp.ne.s32.totalorder %s18_s20, %s779_s23  ;;  %p785_p7 = scmp.lt.s32.totalorder %s779_s23, %s779_s23 }
  0x13   :  { %p786_p8 = por %p785_p7, %p784_p6 }
  0x15   :  { %p787_p9 = pnand %p786_p8, %p780_p5 }
  0x17   :  { %790 = shalt.err (!%p787_p9)
}
  0x18   :  { %20 = dma.hbm_to_vmem [thread:$0]  %s919_s0, 128, %s18_s20, [#allocation3]  }
  0x19   :  { %s799_s26 = scalar_lea.vmem %s39_s22, 64  ;;  %p804_p11 = scmp.lt.s32.totalorder %s39_s22, %s39_s22 }
  0x1a   :  { %p800_p10 = scmp.ne.s32.totalorder %s39_s22, %s799_s26  ;;  %p805_p12 = scmp.lt.s32.totalorder %s799_s26, %s799_s26 }
  0x1c   :  { %p806_p13 = por %p805_p12, %p804_p11 }
  0x1e   :  { %p807_p0 = pnand %p806_p13, %p800_p10 }
  0x20   :  { %810 = shalt.err (!%p807_p0)
}
  0x21   :  { %s842_s1 = smov 16   ;;  %s843_s27 = smov 1  }
  0x22   :  { %44 = dma.hbm_to_vmem [thread:$0]  %s921_s2, 64, %s39_s22, [#allocation6], %s842_s1, %s842_s1, %s843_s27  }
  0x23   :  { %831 = dma.done.wait [#allocation3], 128  }
  0x24   :  { %832 = vsyncadd [#allocation3], 4294967168 }
  0x25   :  { %833 = dma.done.wait [#allocation6], 4160  }
  0x26   :  { %834 = vsyncadd [#allocation6], 4294963136  ;;  %v844_v0 = vmov 0.0   ;;  %vm845_vm0 = vmmov 0   ;;  %v707_v1 = vld [vmem:[#allocation5 + $0x38] sm:$0xff]   ;;  %v708_v2 = vld [vmem:[#allocation5 + $0x30] sm:$0xff]  }
  0x27   :  { %617 = vmatprep.subr.bf16.mxu0 %v844_v0  ;;  %633 = vmatprep.mubr.msk.bf16.mxu0 %vm845_vm0, %v844_v0  ;;  %v709_v3 = vld [vmem:[#allocation5 + $0x28] sm:$0xff]   ;;  %v710_v4 = vld [vmem:[#allocation5 + $0x20] sm:$0xff]   ;;  %v711_v5 = vld [vmem:[#allocation5 + $0x18] sm:$0xff]   ;;  %s846_s0 = smov [#allocation8]  }
  0x28   :  { %637 = vmatprep.subr.bf16.mxu1 %v844_v0  ;;  %653 = vmatprep.mubr.msk.bf16.mxu1 %vm845_vm0, %v844_v0  ;;  %v712_v6 = vld [vmem:[#allocation5 + $0x10] sm:$0xff]   ;;  %v713_v7 = vld [vmem:[#allocation5 + $0x8] sm:$0xff]   ;;  %v714_v8 = vld [vmem:[#allocation5] sm:$0xff]   ;;  %s535_s2 = sshll.u32 %s846_s0, 4  ;;  %s536_s2 = int_to_ptr.vmem [resolvable:$true] %s535_s2 }
  0x29   :  { %618 = vmatpush3.bf16.msra.mxu0 %v707_v1  ;;  %v55_v9 = vld [vmem:[#allocation2] sm:$0xff]  ;;  %v716_v12 = vld [vmem:[#allocation5 + $0x70] sm:$0xff]   ;;  %v717_v13 = vld [vmem:[#allocation5 + $0x68] sm:$0xff]   ;;  %s811_s30 = scalar_lea.vmem %s536_s2, 128  ;;  %p816_p2 = scmp.lt.s32.totalorder %s536_s2, %s536_s2 }
  0x2a   :  { %619 = vmatprep.subr.bf16.mxu0 %v844_v0  ;;  %v56_v10 = vpack.c.bf16 %v55_v9, %v55_v9  ;;  %v715_v11 = vld [vmem:[#allocation5 + $0x78] sm:$0xff]   ;;  %v718_v14 = vld [vmem:[#allocation5 + $0x60] sm:$0xff]   ;;  %v720_v16 = vld [vmem:[#allocation5 + $0x50] sm:$0xff]   ;;  %p812_p1 = scmp.ne.s32.totalorder %s536_s2, %s811_s30  ;;  %p817_p3 = scmp.lt.s32.totalorder %s811_s30, %s811_s30 }
  0x2b   :  { %638 = vmatpush3.bf16.msra.mxu1 %v715_v11  ;;  %v719_v15 = vld [vmem:[#allocation5 + $0x58] sm:$0xff]   ;;  %v721_v17 = vld [vmem:[#allocation5 + $0x48] sm:$0xff]   ;;  %v722_v18 = vld [vmem:[#allocation5 + $0x40] sm:$0xff]  }
  0x2c   :  { %639 = vmatprep.subr.bf16.mxu1 %v844_v0  ;;  %v545_v19 = vld [vmem:[#allocation7] ss:$0 sm:$0xff]  ;;  %v723_v32 = vld [vmem:[#allocation5 + $0xb8] sm:$0xff]   ;;  %v724_v33 = vld [vmem:[#allocation5 + $0xb0] sm:$0xff]   ;;  %p818_p4 = por %p817_p3, %p816_p2 }
  0x2d   :  { %620 = vmatpush3.bf16.msra.mxu0 %v708_v2  ;;  %v725_v34 = vld [vmem:[#allocation5 + $0xa8] sm:$0xff]   ;;  %v726_v35 = vld [vmem:[#allocation5 + $0xa0] sm:$0xff]   ;;  %v727_v36 = vld [vmem:[#allocation5 + $0x98] sm:$0xff]  }
  0x2e   :  { %621 = vmatprep.subr.bf16.mxu0 %v844_v0  ;;  %v728_v37 = vld [vmem:[#allocation5 + $0x90] sm:$0xff]   ;;  %v729_v38 = vld [vmem:[#allocation5 + $0x88] sm:$0xff]   ;;  %v730_v39 = vld [vmem:[#allocation5 + $0x80] sm:$0xff]   ;;  %p819_p5 = pnand %p818_p4, %p812_p1 }
  0x2f   :  { %640 = vmatpush3.bf16.msra.mxu1 %v716_v12  ;;  %v554_v40 = vld [vmem:[#allocation7 + $0x1] ss:$0 sm:$0xff]  ;;  %v731_v53 = vld [vmem:[#allocation5 + $0xf8] sm:$0xff]   ;;  %v732_v54 = vld [vmem:[#allocation5 + $0xf0] sm:$0xff]  }
  0x30   :  { %641 = vmatprep.subr.bf16.mxu1 %v844_v0  ;;  %v733_v55 = vld [vmem:[#allocation5 + $0xe8] sm:$0xff]   ;;  %v734_v56 = vld [vmem:[#allocation5 + $0xe0] sm:$0xff]   ;;  %v735_v57 = vld [vmem:[#allocation5 + $0xd8] sm:$0xff]  }
  0x31   :  { %622 = vmatpush3.bf16.msra.mxu0 %v709_v3  ;;  %v736_v58 = vld [vmem:[#allocation5 + $0xd0] sm:$0xff]   ;;  %v737_v59 = vld [vmem:[#allocation5 + $0xc8] sm:$0xff]   ;;  %v738_v60 = vld [vmem:[#allocation5 + $0xc0] sm:$0xff]  }
  0x32   :  { %623 = vmatprep.subr.bf16.mxu0 %v844_v0  ;;  %v563_v61 = vld [vmem:[#allocation7 + $0x2] ss:$0 sm:$0xff]  ;;  %v572_v11 = vld [vmem:[#allocation7 + $0x3] ss:$0 sm:$0xff] }
  0x33   :  { %642 = vmatpush3.bf16.msra.mxu1 %v717_v13 }
  0x34   :  { %643 = vmatprep.subr.bf16.mxu1 %v844_v0 }
  0x35   :  { %624 = vmatpush3.bf16.msra.mxu0 %v710_v4 }
  0x36   :  { %625 = vmatprep.subr.bf16.mxu0 %v844_v0 }
  0x37   :  { %644 = vmatpush3.bf16.msra.mxu1 %v718_v14 }
  0x38   :  { %645 = vmatprep.subr.bf16.mxu1 %v844_v0 }
  0x39   :  { %626 = vmatpush3.bf16.msra.mxu0 %v711_v5 }
  0x3a   :  { %627 = vmatprep.subr.bf16.mxu0 %v844_v0 }
  0x3b   :  { %646 = vmatpush3.bf16.msra.mxu1 %v719_v15 }
  0x3c   :  { %647 = vmatprep.subr.bf16.mxu1 %v844_v0 }
  0x3d   :  { %628 = vmatpush3.bf16.msra.mxu0 %v712_v6 }
  0x3e   :  { %629 = vmatprep.subr.bf16.mxu0 %v844_v0 }
  0x3f   :  { %648 = vmatpush3.bf16.msra.mxu1 %v720_v16 }
  0x40   :  { %649 = vmatprep.subr.bf16.mxu1 %v844_v0 }
  0x41   :  { %630 = vmatpush3.bf16.msra.mxu0 %v713_v7 }
  0x42   :  { %631 = vmatprep.subr.bf16.mxu0 %v844_v0 }
  0x43   :  { %650 = vmatpush3.bf16.msra.mxu1 %v721_v17 }
  0x44   :  { %651 = vmatprep.subr.bf16.mxu1 %v844_v0 }
  0x45   :  { %632 = vmatpush3.bf16.msra.mxu0 %v714_v8 }
  0x46   :  { %657 = vmatprep.subr.bf16.mxu0 %v844_v0 }
  0x47   :  { %652 = vmatpush3.bf16.msra.mxu1 %v722_v18 }
  0x48   :  { %634 = vmatmul.mubr.bf16.vlgmr.msra.gmra.mxu0 %v56_v10  ;;  %677 = vmatprep.subr.bf16.mxu1 %v844_v0 }
  0x49   :  { %673 = vmatprep.mubr.msk.bf16.mxu0 %vm845_vm0, %v844_v0  ;;  %658 = vmatpush3.bf16.msra.mxu0 %v723_v32 }
  0x4a   :  { %659 = vmatprep.subr.bf16.mxu0 %v844_v0 }
  0x4d   :  { %660 = vmatpush3.bf16.msra.mxu0 %v724_v33 }
  0x4e   :  { %661 = vmatprep.subr.bf16.mxu0 %v844_v0 }
  0x51   :  { %662 = vmatpush3.bf16.msra.mxu0 %v725_v34 }
  0x52   :  { %663 = vmatprep.subr.bf16.mxu0 %v844_v0 }
  0x55   :  { %664 = vmatpush3.bf16.msra.mxu0 %v726_v35 }
  0x56   :  { %665 = vmatprep.subr.bf16.mxu0 %v844_v0 }
  0x59   :  { %666 = vmatpush3.bf16.msra.mxu0 %v727_v36 }
  0x5a   :  { %667 = vmatprep.subr.bf16.mxu0 %v844_v0 }
  0x5d   :  { %668 = vmatpush3.bf16.msra.mxu0 %v728_v37 }
  0x5e   :  { %669 = vmatprep.subr.bf16.mxu0 %v844_v0 }
  0x61   :  { %670 = vmatpush3.bf16.msra.mxu0 %v729_v38 }
  0x62   :  { %671 = vmatprep.subr.bf16.mxu0 %v844_v0 }
  0x65   :  { %672 = vmatpush3.bf16.msra.mxu0 %v730_v39 }
 0x108   :  { %v162_v20 = vpop.f32.mrf.mxu0 }
 0x109   :  { %v163_v21 = vadd.f32 %v545_v19, %v162_v20 }
 0x10a   :  { %v635_v22 = vpop.f32.mrf.mxu0 }
 0x10b   :  { %v168_v23 = vsub.f32 0.0, %v163_v21 }
 0x10c   :  { %v165_v24 = vpop.f32.mrf.mxu0 }
 0x10d   :  { %v169_v25 = vmul.f32 1.442695, %v168_v23 }
 0x10e   :  { %v636_v26 = vpop.f32.mrf.mxu0 }
 0x10f   :  { %739 = vpow2.f32 %v169_v25 }
 0x11c   :  { %v740_v27 = vpop.eup %739 }
 0x11d   :  { %v171_v28 = vadd.f32 1.0, %v740_v27 }
 0x11f   :  { %741 = vrcp.f32 %v171_v28 }
 0x12c   :  { %v742_v29 = vpop.eup %741 }
 0x12d   :  { %v173_v30 = vmul.f32 %v742_v29, %v163_v21 }
 0x12f   :  { %v174_v31 = vpack.c.bf16 %v173_v30, %v173_v30 }
 0x131   :  { %654 = vmatmul.mubr.bf16.vlgmr.msra.gmra.mxu1 %v174_v31 }
 0x132   :  { %693 = vmatprep.mubr.msk.bf16.mxu1 %vm845_vm0, %v844_v0  ;;  %678 = vmatpush3.bf16.msra.mxu1 %v731_v53 }
 0x133   :  { %679 = vmatprep.subr.bf16.mxu1 %v844_v0 }
 0x136   :  { %680 = vmatpush3.bf16.msra.mxu1 %v732_v54 }
 0x137   :  { %681 = vmatprep.subr.bf16.mxu1 %v844_v0 }
 0x13a   :  { %682 = vmatpush3.bf16.msra.mxu1 %v733_v55 }
 0x13b   :  { %683 = vmatprep.subr.bf16.mxu1 %v844_v0 }
 0x13e   :  { %684 = vmatpush3.bf16.msra.mxu1 %v734_v56 }
 0x13f   :  { %685 = vmatprep.subr.bf16.mxu1 %v844_v0 }
 0x142   :  { %686 = vmatpush3.bf16.msra.mxu1 %v735_v57 }
 0x143   :  { %687 = vmatprep.subr.bf16.mxu1 %v844_v0 }
 0x146   :  { %688 = vmatpush3.bf16.msra.mxu1 %v736_v58 }
 0x147   :  { %689 = vmatprep.subr.bf16.mxu1 %v844_v0 }
 0x14a   :  { %690 = vmatpush3.bf16.msra.mxu1 %v737_v59 }
 0x14b   :  { %691 = vmatprep.subr.bf16.mxu1 %v844_v0 }
 0x14e   :  { %692 = vmatpush3.bf16.msra.mxu1 %v738_v60 }
 0x1f1   :  { %v282_v41 = vpop.f32.mrf.mxu1 }
 0x1f2   :  { %v283_v42 = vadd.f32 %v554_v40, %v282_v41 }
 0x1f3   :  { %v655_v43 = vpop.f32.mrf.mxu1 }
 0x1f4   :  { %v288_v44 = vsub.f32 0.0, %v283_v42 }
 0x1f5   :  { %v285_v45 = vpop.f32.mrf.mxu1 }
 0x1f6   :  { %v289_v46 = vmul.f32 1.442695, %v288_v44 }
 0x1f7   :  { %v656_v47 = vpop.f32.mrf.mxu1 }
 0x1f8   :  { %743 = vpow2.f32 %v289_v46 }
 0x205   :  { %v744_v48 = vpop.eup %743 }
 0x206   :  { %v291_v49 = vadd.f32 1.0, %v744_v48 }
 0x208   :  { %745 = vrcp.f32 %v291_v49 }
 0x215   :  { %v746_v50 = vpop.eup %745 }
 0x216   :  { %v293_v51 = vmul.f32 %v746_v50, %v283_v42 }
 0x218   :  { %v294_v52 = vpack.c.bf16 %v293_v51, %v293_v51 }
 0x21a   :  { %674 = vmatmul.mubr.bf16.vlgmr.msra.gmra.mxu0 %v294_v52 }
 0x2da   :  { %v402_v62 = vpop.f32.mrf.mxu0 }
 0x2db   :  { %v403_v63 = vadd.f32 %v563_v61, %v402_v62 }
 0x2dc   :  { %v675_v1 = vpop.f32.mrf.mxu0 }
 0x2dd   :  { %v408_v2 = vsub.f32 0.0, %v403_v63 }
 0x2de   :  { %v405_v3 = vpop.f32.mrf.mxu0 }
 0x2df   :  { %v409_v4 = vmul.f32 1.442695, %v408_v2 }
 0x2e0   :  { %v676_v5 = vpop.f32.mrf.mxu0 }
 0x2e1   :  { %747 = vpow2.f32 %v409_v4 }
 0x2ee   :  { %v748_v6 = vpop.eup %747 }
 0x2ef   :  { %v411_v7 = vadd.f32 1.0, %v748_v6 }
 0x2f1   :  { %749 = vrcp.f32 %v411_v7 }
 0x2fe   :  { %v750_v8 = vpop.eup %749 }
 0x2ff   :  { %v413_v9 = vmul.f32 %v750_v8, %v403_v63 }
 0x301   :  { %v414_v10 = vpack.c.bf16 %v413_v9, %v413_v9 }
 0x303   :  { %694 = vmatmul.mubr.bf16.vlgmr.msra.gmra.mxu1 %v414_v10 }
 0x3c3   :  { %v522_v0 = vpop.f32.mrf.mxu1 }
 0x3c4   :  { %v523_v12 = vadd.f32 %v572_v11, %v522_v0 }
 0x3c5   :  { %v695_v13 = vpop.f32.mrf.mxu1 }
 0x3c6   :  { %528 = vst [vmem:[#allocation8] sm:$0xff] %v523_v12 }
 0x3c7   :  { %v525_v14 = vpop.f32.mrf.mxu1 }
 0x3c8   :  { %822 = shalt.err (!%p819_p5)
}
 0x3c9   :  { %538 = dma.vmem_to_hbm [thread:$0]  %s536_s2, 128, %s922_s3, [#allocation4]   ;;  %v696_v15 = vpop.f32.mrf.mxu1 }
 0x3ca   :  { %835 = dma.done.wait [#allocation4], 128  }
 0x3cb   :  { %836 = vsyncadd [#allocation4], 4294967168 }
 0x3cc   :  { %542 = vsyncpa [#allocation3], 1 }
 0x3cd   :  { %543 = vsyncpa [#allocation6], 1 }
 0x3ce   :  { %544 = vsyncpa [#allocation4], 1 }

</bundles_post_ra>
